<compile_context>
chip_gen: v7x
topology: tpu7x:2x2x1
jax: 0.10.0
libtpu: 0.0.40
codegen_flags: <defaults>
</compile_context>

<pallas_src>
import functools

import jax
import jax.numpy as jnp
from jax.experimental import pallas as pl
from jax.experimental.pallas import tpu as pltpu

_MIB = 1024 * 1024
_RESIDENT_WEIGHT_BYTES = 10 * _MIB  # keep weight VMEM-resident below this size


def _round_up(x: int, m: int) -> int:
    return ((x + m - 1) // m) * m


def _cdiv(a: int, b: int) -> int:
    return -(-a // b)


@functools.lru_cache(maxsize=None)
def _scoped_vmem_limit() -> int:
    """~48 MiB on v7x (64 MiB physical VMEM), ~96 MiB on v5e/v6e (128 MiB)."""
    try:
        cap = int(pltpu.get_tpu_info().vmem_capacity_bytes)
    except Exception:
        cap = 64 * _MIB  # conservative fallback, safe on all generations
    return int(min(cap * 3 // 4, 96 * _MIB))


# ---------------------------------------------------------------------------
# Linear:  y = x @ w_t + b    (w_t pre-transposed to (In, Out), pre-cast)
# ---------------------------------------------------------------------------

def _linear_resident_kernel(x_ref, w_ref, b_ref, o_ref):
    # Full-K dot per row tile; weight block has a constant index_map so it is
    # DMA'd into VMEM exactly once and stays resident across the whole grid.
    x = x_ref[...].astype(w_ref.dtype)                      # in-VMEM cast (f32->bf16 or no-op)
    acc = jnp.dot(x, w_ref[...], preferred_element_type=jnp.float32)
    o_ref[...] = (acc + b_ref[...]).astype(o_ref.dtype)     # bias applied exactly once


def _linear_tiled_kernel(x_ref, w_ref, b_ref, o_ref, acc_ref):
    k = pl.program_id(2)

    @pl.when(k == 0)
    def _init():
        acc_ref[...] = jnp.zeros_like(acc_ref)

    acc_ref[...] += jnp.dot(x_ref[...].astype(w_ref.dtype), w_ref[...],
                            preferred_element_type=jnp.float32)

    @pl.when(k == pl.num_programs(2) - 1)
    def _finalize():
        o_ref[...] = (acc_ref[...] + b_ref[...]).astype(o_ref.dtype)


def pallas_linear(x2d, w_t, b_row, *, out_dtype, vmem_limit):
    """nn.Linear semantics: y = x2d @ w_t + b. w_t: (In, Out) pre-cast, b_row: (1, Out) f32."""
    M, In = x2d.shape
    Out = w_t.shape[1]
    w_bytes = In * Out * jnp.dtype(w_t.dtype).itemsize

    if w_bytes <= _RESIDENT_WEIGHT_BYTES:
        # Resident-weight path: grid only over row tiles, weight fetched once.
        nsteps = _cdiv(M, 512)
        tm = _round_up(_cdiv(M, nsteps), 8)
        Mp = tm * nsteps
        x_p = x2d if Mp == M else jnp.zeros((Mp, In), x2d.dtype).at[:M].set(x2d)
        out = pl.pallas_call(
            _linear_resident_kernel,
            out_shape=jax.ShapeDtypeStruct((Mp, Out), out_dtype),
            grid=(nsteps,),
            in_specs=[
                pl.BlockSpec((tm, In), lambda i: (i, 0)),
                pl.BlockSpec((In, Out), lambda i: (0, 0)),   # constant -> resident
                pl.BlockSpec((1, Out), lambda i: (0, 0)),
            ],
            out_specs=pl.BlockSpec((tm, Out), lambda i: (i, 0)),
            compiler_params=pltpu.CompilerParams(
                dimension_semantics=("parallel",),
                vmem_limit_bytes=vmem_limit,
            ),
        )(x_p, w_t, b_row)
        return out[:M] if Mp != M else out

    # Fallback: classic 3-D tiled matmul with f32 VMEM accumulator (large weights).
    tm_cap = tn_cap = tk_cap = 512
    tm = M if M <= tm_cap else tm_cap
    tk = In if In <= tk_cap else tk_cap
    tn = Out if Out <= tn_cap else tn_cap
    Mp, Kp, Np = _round_up(M, tm), _round_up(In, tk), _round_up(Out, tn)
    x_p, w_p, b_p = x2d, w_t, b_row
    if (Mp, Kp) != (M, In):
        x_p = jnp.zeros((Mp, Kp), x2d.dtype).at[:M, :In].set(x2d)
    if (Kp, Np) != (In, Out):
        w_p = jnp.zeros((Kp, Np), w_t.dtype).at[:In, :Out].set(w_t)
    if Np != Out:
        b_p = jnp.zeros((1, Np), b_row.dtype).at[:, :Out].set(b_row)
    out = pl.pallas_call(
        _linear_tiled_kernel,
        out_shape=jax.ShapeDtypeStruct((Mp, Np), out_dtype),
        grid=(Mp // tm, Np // tn, Kp // tk),                 # reduction axis last
        in_specs=[
            pl.BlockSpec((tm, tk), lambda i, j, k: (i, k)),
            pl.BlockSpec((tk, tn), lambda i, j, k: (k, j)),
            pl.BlockSpec((1, tn), lambda i, j, k: (0, j)),
        ],
        out_specs=pl.BlockSpec((tm, tn), lambda i, j, k: (i, j)),
        scratch_shapes=[pltpu.VMEM((tm, tn), jnp.float32)],
        compiler_params=pltpu.CompilerParams(
            dimension_semantics=("parallel", "parallel", "arbitrary"),
            vmem_limit_bytes=vmem_limit,
        ),
    )(x_p, w_p, b_p)
    if (Mp, Np) != (M, Out):
        out = out[:M, :Out]
    return out


# ---------------------------------------------------------------------------
# Attention: grid = (batch, query tile); all heads per step; keys stay whole
# ---------------------------------------------------------------------------

def _pick_q_tile(n: int, cap: int = 256) -> int:
    if n <= cap:
        return n
    for t in range(cap, 7, -8):            # largest multiple-of-8 divisor <= cap
        if n % t == 0:
            return t
    return n                                # no aligned divisor: single tile


def _make_attn_kernel(num_heads, scale, approx_recip):
    def attn_kernel(q_ref, k_ref, v_ref, o_ref):
        # q_ref: (tq, H, D)   k_ref, v_ref: (N, H, D)   o_ref: (tq, H*D)
        outs = []
        for h in range(num_heads):          # static unroll; 2-D per-head math
            qh = q_ref[:, h, :]                                   # (tq, D)
            kh = k_ref[:, h, :]                                    # (N, D)
            vh = v_ref[:, h, :]                                    # (N, D)
            energy = jnp.einsum("qd,kd->qk", qh, kh,
                                preferred_element_type=jnp.float32)  # (tq, N) f32
            m = jnp.max(energy, axis=-1, keepdims=True)
            e = jnp.exp(energy - m)
            s = jnp.sum(e, axis=-1, keepdims=True)
            # post-softmax 1/sqrt(E) folded into the denominator reciprocal
            inv = pl.reciprocal(s * scale, approx=approx_recip)
            att = (e * inv).astype(vh.dtype)
            outs.append(jnp.dot(att, vh,
                                preferred_element_type=jnp.float32))  # (tq, D)
        # lane-dense (tq, H*D) store, already in the layout the projection wants
        o_ref[...] = jnp.concatenate(outs, axis=-1).astype(o_ref.dtype)
    return attn_kernel


def pallas_attention(qkv, emb_size, *, compute_dtype, vmem_limit):
    """qkv: (B, N, 3, H, D) in compute_dtype -> out: (B, N, H*D) in compute_dtype."""
    B, N, _, H, D = qkv.shape
    E = H * D
    tq = _pick_q_tile(N)
    scale = float(emb_size) ** 0.5
    approx = compute_dtype != jnp.float32
    kernel = _make_attn_kernel(H, scale, approx)
    return pl.pallas_call(
        kernel,
        out_shape=jax.ShapeDtypeStruct((B, N, E), compute_dtype),
        grid=(B, N // tq),
        in_specs=[
            pl.BlockSpec((None, tq, None, H, D), lambda b, qi: (b, qi, 0, 0, 0)),  # Q
            pl.BlockSpec((None, N, None, H, D), lambda b, qi: (b, 0, 1, 0, 0)),    # K
            pl.BlockSpec((None, N, None, H, D), lambda b, qi: (b, 0, 2, 0, 0)),    # V
        ],
        out_specs=pl.BlockSpec((None, tq, E), lambda b, qi: (b, qi, 0)),
        compiler_params=pltpu.CompilerParams(
            dimension_semantics=("parallel", "parallel"),
            vmem_limit_bytes=vmem_limit,
        ),
    )(qkv, qkv, qkv)


# ---------------------------------------------------------------------------
# Parameter preparation (hoisted out of the forward path) + module wrapper
# ---------------------------------------------------------------------------

def prepare_params(params, emb_size, num_heads, *, compute_dtype=jnp.bfloat16):
    """Permute QKV output features from (h, d, qkv) order to (qkv, h, d) order,
    transpose weights to (In, Out), and cast to compute_dtype — all done once."""
    E, H = emb_size, num_heads
    D = E // H
    # perm[f_new] = f_old  with f_old = h*(D*3) + d*3 + qkv, f_new = qkv*(H*D) + h*D + d
    perm = jnp.arange(3 * E).reshape(H, D, 3).transpose(2, 0, 1).reshape(-1)
    qkv_w = params["qkv_w"][perm, :]          # (3E, E) rows permuted
    qkv_b = params["qkv_b"][perm]
    return {
        "qkv_w_t": qkv_w.T.astype(compute_dtype),            # (E, 3E)
        "qkv_b": qkv_b.astype(jnp.float32).reshape(1, 3 * E),
        "proj_w_t": params["proj_w"].T.astype(compute_dtype),  # (E, E)
        "proj_b": params["proj_b"].astype(jnp.float32).reshape(1, E),
    }


def multi_head_attention(x, prepared, num_heads):
    """x: (B, N, E) float32; prepared = prepare_params(...). Returns (B, N, E) float32."""
    B, N, E = x.shape
    H = num_heads
    D = E // H
    compute_dtype = prepared["qkv_w_t"].dtype
    vmem_limit = _scoped_vmem_limit()

    # fused qkv projection -> feature axis already ordered (qkv, head, d)
    qkv = pallas_linear(x.reshape(B * N, E), prepared["qkv_w_t"], prepared["qkv_b"],
                        out_dtype=compute_dtype, vmem_limit=vmem_limit)   # (B*N, 3E)
    qkv = qkv.reshape(B, N, 3, H, D)          # free reshape, no HBM relayout

    # attention hot path (all heads per step, query-tiled, lane-dense output)
    out = pallas_attention(qkv, E, compute_dtype=compute_dtype,
                           vmem_limit=vmem_limit)                          # (B, N, E)

    # output projection (final result in f32)
    out = pallas_linear(out.reshape(B * N, E), prepared["proj_w_t"], prepared["proj_b"],
                        out_dtype=jnp.float32, vmem_limit=vmem_limit)
    return out.reshape(B, N, E)


def init_params(key, emb_size):
    k1, k2, k3, k4 = jax.random.split(key, 4)
    scale = 1.0 / (emb_size ** 0.5)
    return {
        "qkv_w": jax.random.uniform(k1, (3 * emb_size, emb_size), jnp.float32, -scale, scale),
        "qkv_b": jax.random.uniform(k2, (3 * emb_size,), jnp.float32, -scale, scale),
        "proj_w": jax.random.uniform(k3, (emb_size, emb_size), jnp.float32, -scale, scale),
        "proj_b": jax.random.uniform(k4, (emb_size,), jnp.float32, -scale, scale),
    }


def reference_mha(x, params, num_heads):
    """Pure-JAX reference matching the PyTorch forward (eval mode)."""
    B, N, E = x.shape
    H = num_heads
    D = E // H
    qkv = x.reshape(B * N, E) @ params["qkv_w"].T + params["qkv_b"]
    qkv = qkv.reshape(B, N, H, D, 3)
    qkv = jnp.transpose(qkv, (4, 0, 2, 1, 3))
    q, k, v = qkv[0], qkv[1], qkv[2]
    energy = jnp.einsum("bhqd,bhkd->bhqk", q, k)
    att = jax.nn.softmax(energy, axis=-1) / (E ** 0.5)
    out = jnp.einsum("bhal,bhlv->bhav", att, v)
    out = jnp.transpose(out, (0, 2, 1, 3)).reshape(B * N, E)
    out = out @ params["proj_w"].T + params["proj_b"]
    return out.reshape(B, N, E)


if __name__ == "__main__":
    B, N, E, H = 2, 16, 32, 4  # small shapes consistent with the module

    key = jax.random.PRNGKey(0)
    kx, kp = jax.random.split(key)
    x = jax.random.normal(kx, (B, N, E), jnp.float32)
    params = init_params(kp, E)

    ref = reference_mha(x, params, H)

    # strict f32 path: tight check against the pure-JAX reference
    prep_f32 = prepare_params(params, E, H, compute_dtype=jnp.float32)
    out = jax.block_until_ready(multi_head_attention(x, prep_f32, H))
    assert out.shape == (B, N, E)
    assert jnp.allclose(out, ref, atol=1e-5, rtol=1e-5), "f32 mismatch vs reference"

    # default bf16 path (bf16 MXU operands + bf16 intermediates, f32 softmax/accum)
    prep_bf16 = prepare_params(params, E, H, compute_dtype=jnp.bfloat16)
    out_bf16 = jax.block_until_ready(multi_head_attention(x, prep_bf16, H))
    assert jnp.allclose(out_bf16, ref, atol=5e-2, rtol=5e-2), "bf16 mismatch vs reference"

    print("KERNEL_OK")
</pallas_src>

<mosaic_0001>
module attributes {stable_mosaic.version = 11 : i64} {
  func.func @_linear_resident_kernel(%arg0: i32, %arg1: memref<32x32xf32, #tpu.memory_space<vmem>>, %arg2: memref<32x96xf32, #tpu.memory_space<vmem>>, %arg3: memref<1x96xf32, #tpu.memory_space<vmem>>, %arg4: memref<32x96xf32, #tpu.memory_space<vmem>>) attributes {dimension_semantics = [#tpu.dimension_semantics<parallel>], iteration_bounds = array<i64: 1>, scalar_prefetch = 0 : i64, scratch_operands = 0 : i64, tpu.core_type = #tpu.core_type<tc>, window_params = [{transform_indices = @transform_0, window_bounds = array<i64: 32, 32>}, {pipeline_mode = #tpu.pipeline_mode<synchronous>, transform_indices = @transform_1, window_bounds = array<i64: 32, 96>}, {pipeline_mode = #tpu.pipeline_mode<synchronous>, transform_indices = @transform_2, window_bounds = array<i64: 1, 96>}, {transform_indices = @transform_3, window_bounds = array<i64: 32, 96>}]} {
    %c0 = arith.constant 0 : index
    %c0_0 = arith.constant 0 : index
    %0 = vector.load %arg1[%c0, %c0_0] : memref<32x32xf32, #tpu.memory_space<vmem>>, vector<32x32xf32>
    %c0_1 = arith.constant 0 : index
    %c0_2 = arith.constant 0 : index
    %1 = vector.load %arg2[%c0_1, %c0_2] : memref<32x96xf32, #tpu.memory_space<vmem>>, vector<32x96xf32>
    %cst = arith.constant dense<0.000000e+00> : vector<32x96xf32>
    %2 = tpu.matmul %0, %1, %cst {dimension_numbers = #tpu.dot_dimension_numbers<[1], [0], [0], [1], [0, 0, 1, 1], [], []>} : vector<32x32xf32>, vector<32x96xf32>, vector<32x96xf32> -> vector<32x96xf32>
    %c0_3 = arith.constant 0 : index
    %c0_4 = arith.constant 0 : index
    %3 = vector.load %arg3[%c0_3, %c0_4] : memref<1x96xf32, #tpu.memory_space<vmem>>, vector<1x96xf32>
    %4 = vector.broadcast %3 : vector<1x96xf32> to vector<32x96xf32>
    %5 = arith.addf %2, %4 : vector<32x96xf32>
    %c0_5 = arith.constant 0 : index
    %c0_6 = arith.constant 0 : index
    %6 = vector.load %arg4[%c0_5, %c0_6] : memref<32x96xf32, #tpu.memory_space<vmem>>, vector<32x96xf32>
    tpu.vector_store %arg4[%c0_5, %c0_6], %5 {strides = array<i32>} : memref<32x96xf32, #tpu.memory_space<vmem>>, vector<32x96xf32>,
    return
  }
  func.func @transform_0(%arg0: i32) -> (i32, i32) {
    %c0_i32 = arith.constant 0 : i32
    %c0_i32_0 = arith.constant 0 : i32
    return %arg0, %c0_i32 : i32, i32
  }
  func.func @transform_1(%arg0: i32) -> (i32, i32) {
    %c0_i32 = arith.constant 0 : i32
    %c0_i32_0 = arith.constant 0 : i32
    %c0_i32_1 = arith.constant 0 : i32
    return %c0_i32, %c0_i32_0 : i32, i32
  }
  func.func @transform_2(%arg0: i32) -> (i32, i32) {
    %c0_i32 = arith.constant 0 : i32
    %c0_i32_0 = arith.constant 0 : i32
    %c0_i32_1 = arith.constant 0 : i32
    return %c0_i32, %c0_i32_0 : i32, i32
  }
  func.func @transform_3(%arg0: i32) -> (i32, i32) {
    %c0_i32 = arith.constant 0 : i32
    %c0_i32_0 = arith.constant 0 : i32
    return %arg0, %c0_i32 : i32, i32
  }
}

</mosaic_0001>

<bundles_post_ra>
// kernel: tpu_custom_call.1
= control target key start
LH: loop header
LB: loop body
LE: loop exit
PB: predicated region body
PF: predicated region fallthrough
CT: control target
= control target key end

     0   :  { %8 = vsyncpa [#allocation3], 0  ;;  %s372_s0 = inlined_call_operand.hbm [shape: f32[32,32], index: 0, kind: input, shape index: {}]   ;;  %s373_s1 = inlined_call_operand.hbm [shape: f32[32,96], index: 1, kind: input, shape index: {}]   ;;  %s374_s2 = inlined_call_operand.vmem [shape: f32[1,96], index: 2, kind: input, shape index: {}]   ;;  %s375_s3 = inlined_call_operand.hbm [shape: f32[32,96], index: 3, kind: output, shape index: {}]  }
   0x1   :  { %9 = vsyncpa [#allocation6], 0 }
   0x2   :  { %10 = vsyncpa [#allocation4], 0  ;;  %s295_s12 = smov [#allocation2]   ;;  %s223_s16 = scalar_lea.hbm %s372_s0, 512 }
   0x3   :  { %s16_s13 = sshll.u32 %s295_s12, 4  ;;  %p224_p0 = scmp.ne.s32.totalorder %s372_s0, %s223_s16  ;;  %s17_s13 = int_to_ptr.vmem [resolvable:$true] %s16_s13 }
   0x4   :  { %p227_p1 = scmp.lt.u32.totalorder %s223_s16, %s372_s0 }
   0x6   :  { %p229_p2 = pnand %p227_p1, %p224_p0 }
   0x8   :  { %232 = shalt.err (!%p229_p2)
}
   0x9   :  { %s233_s21 = scalar_lea.vmem %s17_s13, 512  ;;  %p238_p4 = scmp.lt.s32.totalorder %s17_s13, %s17_s13 }
   0xa   :  { %p234_p3 = scmp.ne.s32.totalorder %s17_s13, %s233_s21  ;;  %p239_p5 = scmp.lt.s32.totalorder %s233_s21, %s233_s21 }
   0xc   :  { %p240_p6 = por %p239_p5, %p238_p4 }
   0xe   :  { %p241_p7 = pnand %p240_p6, %p234_p3 }
  0x10   :  { %244 = shalt.err (!%p241_p7)
}
  0x11   :  { %s296_s22 = smov 128   ;;  %s297_s23 = smov 8  }
  0x12   :  { %22 = dma.hbm_to_vmem [thread:$0]  %s372_s0, 512, %s17_s13, [#allocation3], %s296_s22, %s296_s22, %s297_s23  }
  0x13   :  { %s298_s26 = smov [#allocation5]   ;;  %s245_s30 = scalar_lea.hbm %s373_s1, 512 }
  0x14   :  { %s28_s27 = sshll.u32 %s298_s26, 4  ;;  %p246_p8 = scmp.ne.s32.totalorder %s373_s1, %s245_s30  ;;  %s29_s27 = int_to_ptr.vmem [resolvable:$true] %s28_s27 }
  0x15   :  { %p249_p9 = scmp.lt.u32.totalorder %s245_s30, %s373_s1 }
  0x17   :  { %p251_p10 = pnand %p249_p9, %p246_p8 }
  0x19   :  { %254 = shalt.err (!%p251_p10)
}
  0x1a   :  { %s255_s8 = scalar_lea.vmem %s29_s27, 512  ;;  %p260_p12 = scmp.lt.s32.totalorder %s29_s27, %s29_s27 }
  0x1b   :  { %p256_p11 = scmp.ne.s32.totalorder %s29_s27, %s255_s8  ;;  %p261_p13 = scmp.lt.s32.totalorder %s255_s8, %s255_s8 }
  0x1d   :  { %p262_p0 = por %p261_p13, %p260_p12 }
  0x1f   :  { %p263_p1 = pnand %p262_p0, %p256_p11 }
  0x21   :  { %266 = shalt.err (!%p263_p1)
}
  0x22   :  { %34 = dma.hbm_to_vmem [thread:$0]  %s373_s1, 512, %s29_s27, [#allocation6], %s296_s22, %s296_s22, %s297_s23  }
  0x23   :  { %289 = dma.done.wait [#allocation3], 512  }
  0x24   :  { %290 = vsyncadd [#allocation3], 4294966784 }
  0x25   :  { %291 = dma.done.wait [#allocation6], 512  }
  0x26   :  { %292 = vsyncadd [#allocation6], 4294966784  ;;  %vm58_vm0 = vcmask 261120   ;;  %v47_v0 = vld [vmem:[#allocation5] sm:$0xff]  ;;  %v48_v1 = vld [vmem:[#allocation5 + $0x8] sm:$0xff]  ;;  %s299_s11 = smov [#allocation7]  }
  0x27   :  { %v49_v2 = vld [vmem:[#allocation5 + $0x10] sm:$0xff]  ;;  %v206_v3 = vpack.c.bf16 %v48_v1, %v47_v0  ;;  %v50_v4 = vld [vmem:[#allocation5 + $0x18] sm:$0xff]  ;;  %v43_v5 = vld [vmem:[#allocation2] sm:$0xff]  ;;  %s166_s12 = sshll.u32 %s299_s11, 4  ;;  %vm156_vm1 = vcmask 785408   ;;  %s167_s12 = int_to_ptr.vmem [resolvable:$true] %s166_s12 }
  0x28   :  { %v45_v6 = vld [vmem:[#allocation2 + $0x10] sm:$0xff]  ;;  %v210_v7 = vpack.c.bf16 %v50_v4, %v49_v2  ;;  %200 = vmatprep.mubr.msk.f32.mxu0 %vm58_vm0, %v43_v5  ;;  %v44_v8 = vld [vmem:[#allocation2 + $0x8] sm:$0xff]  ;;  %v46_v9 = vld [vmem:[#allocation2 + $0x18] sm:$0xff]  ;;  %s267_s13 = scalar_lea.vmem %s167_s12, 512  ;;  %p272_p3 = scmp.lt.s32.totalorder %s167_s12, %s167_s12 }
  0x29   :  { %203 = vmatprep.mubr.msk.f32.mxu1 %vm58_vm0, %v45_v6  ;;  %207 = vmatprep.subr.bf16.mxu0 %v206_v3  ;;  %v179_v10 = vld [vmem:[%s374_s2] ss:$0 sm:$0xff]  ;;  %p268_p2 = scmp.ne.s32.totalorder %s167_s12, %s267_s13  ;;  %p273_p4 = scmp.lt.s32.totalorder %s267_s13, %s267_s13 }
  0x2a   :  { %214 = vmatprep.subr.bf16.mxu1 %v206_v3  ;;  %209 = vmatpush3.bf16.msra.mxu0 %v206_v3 }
  0x2b   :  { %216 = vmatpush3.bf16.msra.mxu1 %v206_v3  ;;  %211 = vmatprep.subr.bf16.mxu0 %v210_v7  ;;  %p274_p5 = por %p273_p4, %p272_p3 }
  0x2c   :  { %215 = vmatprep.subr.bf16.mxu1 %v210_v7 }
  0x2d   :  { %p275_p6 = pnand %p274_p5, %p268_p2 }
  0x2e   :  { %213 = vmatpush3.bf16.msra.mxu0 %v210_v7 }
  0x2f   :  { %217 = vmatpush3.bf16.msra.mxu1 %v210_v7 }
  0x31   :  { %201 = vmatmul.mubr.msk.f32.vlgmr.msra.gmra.mrb[0].mxu0 %vm58_vm0, %v44_v8 }
  0x32   :  { %204 = vmatmul.mubr.msk.f32.vlgmr.msra.gmra.mrb[0].mxu1 %vm58_vm0, %v46_v9 }
 0x104   :  { %v202_v11 = vpop.f32.mrb[0].mxu0 }
 0x105   :  { %v205_v12 = vpop.f32.mrb[0].mxu1  ;;  %v143_v13 = vadd.f32 %v202_v11, %v179_v10  ;;  %v137_v15 = vpop.f32.mrb[1].mxu0 }
 0x106   :  { %v153_v14 = vadd.f32 %v205_v12, %v179_v10  ;;  %v147_v16 = vpop.f32.mrb[1].mxu1  ;;  %v138_v17 = vadd.f32 %v179_v10, %v137_v15 }
 0x107   :  { %v148_v18 = vadd.f32 %v179_v10, %v147_v16  ;;  %158 = vst.msk [vmem:[#allocation7 + $0x8] sm:$0xff] %vm156_vm1, %v143_v13 }
 0x108   :  { %160 = vst.msk [vmem:[#allocation7 + $0x18] sm:$0xff] %vm156_vm1, %v153_v14  ;;  %157 = vst.msk [vmem:[#allocation7] sm:$0xff] %vm156_vm1, %v138_v17 }
 0x109   :  { %159 = vst.msk [vmem:[#allocation7 + $0x10] sm:$0xff] %vm156_vm1, %v148_v18 }
 0x10a   :  { %278 = shalt.err (!%p275_p6)
}
 0x10b   :  { %s279_s15 = scalar_lea.hbm %s375_s3, 512 }
 0x10c   :  { %p280_p7 = scmp.ne.s32.totalorder %s375_s3, %s279_s15  ;;  %p283_p8 = scmp.lt.u32.totalorder %s279_s15, %s375_s3 }
 0x10e   :  { %p285_p9 = pnand %p283_p8, %p280_p7 }
 0x110   :  { %288 = shalt.err (!%p285_p9)
}
 0x111   :  { %172 = dma.vmem_to_hbm [thread:$0]  %s167_s12, 512, %s375_s3, [#allocation4], %s296_s22, %s296_s22, %s297_s23  }
 0x112   :  { %293 = dma.done.wait [#allocation4], 512  }
 0x113   :  { %294 = vsyncadd [#allocation4], 4294966784 }
 0x114   :  { %176 = vsyncpa [#allocation3], 1 }
 0x115   :  { %177 = vsyncpa [#allocation6], 1 }
 0x116   :  { %178 = vsyncpa [#allocation4], 1 }

</bundles_post_ra>
